<compile_context>
chip_gen: v7x
topology: tpu7x:2x2x1
jax: 0.10.0
libtpu: 0.0.40
codegen_flags: <defaults>
</compile_context>

<pallas_src>
import functools

import jax
import jax.numpy as jnp
from jax.experimental import pallas as pl
from jax.experimental.pallas import tpu as pltpu


# Flips to bf16 (with a wrapper f16 cast) if the Mosaic f16 path is unavailable.
_IO_DTYPE = [jnp.float16]


def _round_up(a, b):
    return (a + b - 1) // b * b


def _choose_tk8(k8):
    """K-chunk size in packed int32 rows (8*tk8 activation columns per step)."""
    for cand in (512, 256, 128):
        if k8 % cand == 0:
            return cand
    return k8   # small / irregular K: single chunk (full-dim block is legal)


def _choose_tm(m):
    if m < 256:
        return _round_up(max(m, 1), 16)      # 16: keep f16/bf16 sublane tiling happy
    for t in (512, 256):                     # biggest tile with <= 25% padding waste
        if _round_up(m, t) - m <= t // 4:
            return t
    return 256


def _choose_tn(n, m_tiles):
    cands = [t for t in (512, 256, 128) if n % t == 0]
    if not cands:
        return n                             # caller asserts N % 128 == 0
    tn = cands[0]
    if m_tiles == 1:
        # Decode: keep >= 2 N tiles so both v7x TensorCores have work.
        for t in cands:
            if n // t >= 2:
                return t
    return tn


def _quant_matmul4_kernel(x_ref, qw_ref, scales_ref, zeros_ref, bias_ref,
                          o_ref, acc_ref, xsum_ref):
    # x_ref:      (tm, 8*tk8) f16/bf16  activations, natural (M, K) layout
    # qw_ref:     (tk8, tn)   int32     packed 4-bit weights, repacked so that
    #                                   nibble plane s <-> x_ref[:, s*tk8:(s+1)*tk8]
    # scales_ref: (1, tn)     f32
    # zeros_ref:  (1, tn)     f32       precomputed (z + 1) * scale
    # bias_ref:   (1, tn)     f32
    # o_ref:      (tm, tn)    f16/bf16
    # acc_ref:    (tm, tn)    f32  VMEM accumulator
    # xsum_ref:   (tm, 1)     f32  VMEM rowsum-of-activations accumulator
    k = pl.program_id(2)
    tk8 = qw_ref.shape[0]

    @pl.when(k == 0)
    def _():
        acc_ref[...] = jnp.zeros_like(acc_ref)
        xsum_ref[...] = jnp.zeros_like(xsum_ref)

    xb = x_ref[...].astype(jnp.bfloat16)                    # MXU operand dtype
    # Rowsum over this K chunk (same operand as the matmul) for the zero-point
    # correction term; the cross-lane reduce lands on the XLU which has slack.
    xsum_ref[...] += jnp.sum(xb.astype(jnp.float32), axis=1, keepdims=True)

    q = qw_ref[...]                                         # (tk8, tn) int32
    acc = acc_ref[...]
    for s in range(8):                                      # static nibble unroll
        nib = q if s == 0 else jnp.right_shift(q, 4 * s)
        nib = jnp.bitwise_and(nib, 15)
        # TODO(synk): cheaper unpack (exponent-bit bf16 trick / int4 MXU on
        # v5e/v6e / fp8 weights on v7x) -- decode is VPU-unpack bound.
        acc = acc + jnp.dot(xb[:, s * tk8:(s + 1) * tk8],
                            nib.astype(jnp.bfloat16),
                            preferred_element_type=jnp.float32)
    acc_ref[...] = acc

    @pl.when(k == pl.num_programs(2) - 1)
    def _():
        out = (acc_ref[...] * scales_ref[...]
               - xsum_ref[...] * zeros_ref[...]
               + bias_ref[...])
        o_ref[...] = out.astype(o_ref.dtype)


@functools.partial(jax.jit, static_argnums=(5,))
def _quant_matmul4(x2, qweight_rp, scales_f32, zeros_f32, bias_f32, io_dtype):
    """x2: (M, K) -> (M, N) float16;  y = x2 @ dequant(W) + bias."""
    M, K = x2.shape
    K8, N = qweight_rp.shape
    assert K == 8 * K8 and K % 32 == 0
    assert N % 128 == 0, "outfeatures must be a multiple of 128 for the TPU tile"

    tk8 = _choose_tk8(K8)
    tk = 8 * tk8
    tm = _choose_tm(M)
    m_pad = _round_up(M, tm)
    m_tiles = m_pad // tm
    tn = _choose_tn(N, m_tiles)
    n_tiles = N // tn

    xb = x2.astype(io_dtype)
    if m_pad != M:
        xb = jnp.pad(xb, ((0, m_pad - M), (0, 0)))

    grid = (m_tiles, n_tiles, K8 // tk8)

    out = pl.pallas_call(
        _quant_matmul4_kernel,
        out_shape=jax.ShapeDtypeStruct((m_pad, N), io_dtype),
        grid_spec=pltpu.PrefetchScalarGridSpec(
            num_scalar_prefetch=0,
            grid=grid,
            in_specs=[
                pl.BlockSpec((tm, tk),  lambda i, j, k: (i, k)),   # activations
                pl.BlockSpec((tk8, tn), lambda i, j, k: (k, j)),   # packed weights
                pl.BlockSpec((1, tn),   lambda i, j, k: (0, j)),   # scales
                pl.BlockSpec((1, tn),   lambda i, j, k: (0, j)),   # (z+1)*scale
                pl.BlockSpec((1, tn),   lambda i, j, k: (0, j)),   # bias
            ],
            out_specs=pl.BlockSpec((tm, tn), lambda i, j, k: (i, j)),
            scratch_shapes=[pltpu.VMEM((tm, tn), jnp.float32),     # accumulator
                            pltpu.VMEM((tm, 1), jnp.float32)],     # rowsum(x)
        ),
        compiler_params=pltpu.CompilerParams(
            dimension_semantics=("parallel", "parallel", "arbitrary"),
            vmem_limit_bytes=32 * 1024 * 1024),
        cost_estimate=pl.CostEstimate(
            flops=2 * m_pad * N * K,
            transcendentals=0,
            bytes_accessed=(m_pad * K * 2 * n_tiles      # activations (per N tile)
                            + K8 * N * 4 * m_tiles       # packed weights (per M tile)
                            + m_pad * N * 2)),           # output
    )(xb, qweight_rp, scales_f32, zeros_f32, bias_f32)

    return out[:M].astype(jnp.float16)


class QuantLinearPallas:
    """GPTQ 4-bit, groupsize=-1 QuantLinear.forward on TPU via Pallas."""

    def __init__(self, qweight, scales, qzeros, bias):
        K8, N = qweight.shape
        K = 8 * K8
        assert scales.shape == (1, N)
        assert qzeros.shape == (1, N // 8)
        assert bias.shape == (N,)
        self.infeatures = K
        self.outfeatures = N

        # -------- one-time weight-only preprocessing (off the hot path) ------
        # (1) Repack qweight so that, for the kernel's chunking of tk8 packed
        #     rows, nibble plane s of chunk c holds the weights of the
        #     contiguous original-K range [c*8*tk8 + s*tk8, c*8*tk8 + (s+1)*tk8).
        #     This lets the kernel consume activations in their natural (M, K)
        #     layout with a plain contiguous lane slice per nibble plane.
        tk8 = _choose_tk8(K8)
        shifts = jnp.arange(8, dtype=jnp.int32) * 4
        w4 = jnp.bitwise_and(
            jnp.right_shift(qweight[:, None, :], shifts[None, :, None]), 15)
        w4 = w4.reshape(K, N)                           # row index == original k
        w4 = w4.reshape(K8 // tk8, 8, tk8, N)           # [chunk, s, r, n]
        qw_rp = jnp.zeros((K8 // tk8, tk8, N), jnp.int32)
        for s in range(8):
            qw_rp = qw_rp | (w4[:, s] << (4 * s))
        self.qweight_rp = qw_rp.reshape(K8, N)

        # (2) Unpack 4-bit zero points, fold (z + 1) * scale; f32 scales / bias.
        z = jnp.repeat(qzeros.reshape(-1), 8)                         # (N,)
        shifter = (jnp.arange(N, dtype=jnp.int32) % 8) * 4
        z = jnp.bitwise_and(jnp.right_shift(z, shifter), 15)
        self.scales_f32 = scales.astype(jnp.float32).reshape(1, N)
        self.zeros_f32 = ((z.astype(jnp.float32) + 1.0)
                          * self.scales_f32[0]).reshape(1, N)
        self.bias_f32 = bias.astype(jnp.float32).reshape(1, N)

    def __call__(self, x):
        *lead, K = x.shape
        assert K == self.infeatures
        x2 = x.reshape(-1, K)
        try:
            y = _quant_matmul4(x2, self.qweight_rp, self.scales_f32,
                               self.zeros_f32, self.bias_f32, _IO_DTYPE[0])
        except Exception:
            if _IO_DTYPE[0] == jnp.bfloat16:
                raise
            # TODO(synk): drop this fallback once direct f16 stores are
            # confirmed on every target Mosaic toolchain.
            _IO_DTYPE[0] = jnp.bfloat16
            y = _quant_matmul4(x2, self.qweight_rp, self.scales_f32,
                               self.zeros_f32, self.bias_f32, _IO_DTYPE[0])
        return y.reshape(*lead, self.outfeatures)


if __name__ == "__main__":
    key = jax.random.PRNGKey(0)
    bits = 4
    fpi = 32 // bits                    # 8 nibbles per int32
    infeatures, outfeatures = 64, 256   # K, N  (K % 32 == 0, N % 128 == 0)
    batch, seq = 2, 8

    k1, k2, k3, k4, k5 = jax.random.split(key, 5)
    # Deterministic synthetic "checkpoint": unpacked 4-bit values, then pack.
    w4 = jax.random.randint(k1, (infeatures, outfeatures), 0, 16, dtype=jnp.int32)
    z4 = jax.random.randint(k2, (outfeatures,), 0, 16, dtype=jnp.int32)
    scales = (jax.random.uniform(k3, (1, outfeatures)) * 0.02 + 0.005).astype(jnp.float16)
    bias = (jax.random.normal(k4, (outfeatures,)) * 0.1).astype(jnp.float16)
    x = jax.random.normal(k5, (batch, seq, infeatures)).astype(jnp.float16)

    # Pack weights along K: qweight[r, n] = OR_s (w4[8r+s, n] << 4s)
    w4r = w4.reshape(infeatures // fpi, fpi, outfeatures)
    qweight = jnp.zeros((infeatures // fpi, outfeatures), jnp.int32)
    for s in range(fpi):
        qweight = qweight | (w4r[:, s, :] << (4 * s))
    # Pack zero points along N: qzeros[0, j] = OR_s (z4[8j+s] << 4s)
    z4r = z4.reshape(outfeatures // fpi, fpi)
    qzeros = jnp.zeros((outfeatures // fpi,), jnp.int32)
    for s in range(fpi):
        qzeros = qzeros | (z4r[:, s] << (4 * s))
    qzeros = qzeros.reshape(1, outfeatures // fpi)

    layer = QuantLinearPallas(qweight, scales, qzeros, bias)
    y = jax.block_until_ready(layer(x))

    # Pure-JAX reference of the same math.
    w_deq = (w4.astype(jnp.float32)
             - (z4.astype(jnp.float32) + 1.0)[None, :]) * scales.astype(jnp.float32)
    ref = (x.astype(jnp.float32).reshape(-1, infeatures) @ w_deq).astype(jnp.float16)
    ref = (ref + bias[None, :]).reshape(batch, seq, outfeatures)

    assert y.shape == (batch, seq, outfeatures)
    assert y.dtype == jnp.float16
    assert jnp.allclose(y.astype(jnp.float32), ref.astype(jnp.float32),
                        rtol=2e-2, atol=2e-2)
    print("KERNEL_OK")
</pallas_src>

<mosaic_0001>
module attributes {stable_mosaic.version = 11 : i64} {
  func.func @_quant_matmul4_kernel(%arg0: i32, %arg1: i32, %arg2: i32, %arg3: memref<16x64xbf16, #tpu.memory_space<vmem>>, %arg4: memref<8x128xi32, #tpu.memory_space<vmem>>, %arg5: memref<1x128xf32, #tpu.memory_space<vmem>>, %arg6: memref<1x128xf32, #tpu.memory_space<vmem>>, %arg7: memref<1x128xf32, #tpu.memory_space<vmem>>, %arg8: memref<16x128xbf16, #tpu.memory_space<vmem>>, %arg9: memref<16x128xf32, #tpu.memory_space<vmem>>, %arg10: memref<16x1xf32, #tpu.memory_space<vmem>>) attributes {dimension_semantics = [#tpu.dimension_semantics<parallel>, #tpu.dimension_semantics<parallel>, #tpu.dimension_semantics<arbitrary>], iteration_bounds = array<i64: 1, 2, 1>, scalar_prefetch = 0 : i64, scratch_operands = 2 : i64, tpu.core_type = #tpu.core_type<tc>, window_params = [{transform_indices = @transform_0, window_bounds = array<i64: 16, 64>}, {transform_indices = @transform_1, window_bounds = array<i64: 8, 128>}, {transform_indices = @transform_2, window_bounds = array<i64: 1, 128>}, {transform_indices = @transform_3, window_bounds = array<i64: 1, 128>}, {transform_indices = @transform_4, window_bounds = array<i64: 1, 128>}, {transform_indices = @transform_5, window_bounds = array<i64: 16, 128>}]} {
    %c0_i32 = arith.constant 0 : i32
    %0 = arith.cmpi eq, %arg2, %c0_i32 : i32
    %1 = arith.extui %0 : i1 to i32
    %c0_i32_0 = arith.constant 0 : i32
    %2 = arith.cmpi ne, %1, %c0_i32_0 : i32
    scf.if %2 {
      %cst_29 = arith.constant 0.000000e+00 : f32
      %78 = vector.broadcast %cst_29 : f32 to vector<16x128xf32>
      %c0_30 = arith.constant 0 : index
      %c0_31 = arith.constant 0 : index
      %79 = vector.load %arg9[%c0_30, %c0_31] : memref<16x128xf32, #tpu.memory_space<vmem>>, vector<16x128xf32>
      tpu.vector_store %arg9[%c0_30, %c0_31], %78 {strides = array<i32>} : memref<16x128xf32, #tpu.memory_space<vmem>>, vector<16x128xf32>,
      %cst_32 = arith.constant 0.000000e+00 : f32
      %80 = vector.broadcast %cst_32 : f32 to vector<16x1xf32>
      %c0_33 = arith.constant 0 : index
      %c0_34 = arith.constant 0 : index
      %81 = vector.load %arg10[%c0_33, %c0_34] : memref<16x1xf32, #tpu.memory_space<vmem>>, vector<16x1xf32>
      tpu.vector_store %arg10[%c0_33, %c0_34], %80 {strides = array<i32>} : memref<16x1xf32, #tpu.memory_space<vmem>>, vector<16x1xf32>,
    } else {
    }
    %c0 = arith.constant 0 : index
    %c0_1 = arith.constant 0 : index
    %3 = vector.load %arg3[%c0, %c0_1] : memref<16x64xbf16, #tpu.memory_space<vmem>>, vector<16x64xbf16>
    %c0_2 = arith.constant 0 : index
    %c0_3 = arith.constant 0 : index
    %4 = vector.load %arg10[%c0_2, %c0_3] : memref<16x1xf32, #tpu.memory_space<vmem>>, vector<16x1xf32>
    %5 = arith.extf %3 : vector<16x64xbf16> to vector<16x64xf32>
    %cst = arith.constant dense<0.000000e+00> : vector<16xf32>
    %6 = vector.multi_reduction <add>, %5, %cst [1] : vector<16x64xf32> to vector<16xf32>
    %7 = vector.shape_cast %6 : vector<16xf32> to vector<16x1xf32>
    %8 = arith.addf %4, %7 : vector<16x1xf32>
    %c0_4 = arith.constant 0 : index
    %c0_5 = arith.constant 0 : index
    %9 = vector.load %arg10[%c0_4, %c0_5] : memref<16x1xf32, #tpu.memory_space<vmem>>, vector<16x1xf32>
    tpu.vector_store %arg10[%c0_4, %c0_5], %8 {strides = array<i32>} : memref<16x1xf32, #tpu.memory_space<vmem>>, vector<16x1xf32>,
    %c0_6 = arith.constant 0 : index
    %c0_7 = arith.constant 0 : index
    %10 = vector.load %arg4[%c0_6, %c0_7] : memref<8x128xi32, #tpu.memory_space<vmem>>, vector<8x128xi32>
    %c0_8 = arith.constant 0 : index
    %c0_9 = arith.constant 0 : index
    %11 = vector.load %arg9[%c0_8, %c0_9] : memref<16x128xf32, #tpu.memory_space<vmem>>, vector<16x128xf32>
    %c15_i32 = arith.constant 15 : i32
    %12 = vector.broadcast %c15_i32 : i32 to vector<8x128xi32>
    %13 = arith.andi %10, %12 : vector<8x128xi32>
    %14 = vector.extract_strided_slice %3 {offsets = [0, 0], sizes = [16, 8], strides = [1, 1]} : vector<16x64xbf16> to vector<16x8xbf16>
    %15 = arith.sitofp %13 : vector<8x128xi32> to vector<8x128xbf16>
    %cst_10 = arith.constant dense<0.000000e+00> : vector<16x128xf32>
    %16 = tpu.matmul %14, %15, %cst_10 {dimension_numbers = #tpu.dot_dimension_numbers<[1], [0], [0], [1], [0, 0, 1, 1], [], []>} : vector<16x8xbf16>, vector<8x128xbf16>, vector<16x128xf32> -> vector<16x128xf32>
    %17 = arith.addf %11, %16 : vector<16x128xf32>
    %c4_i32 = arith.constant 4 : i32
    %18 = vector.broadcast %c4_i32 : i32 to vector<8x128xi32>
    %19 = arith.shrsi %10, %18 : vector<8x128xi32>
    %c15_i32_11 = arith.constant 15 : i32
    %20 = vector.broadcast %c15_i32_11 : i32 to vector<8x128xi32>
    %21 = arith.andi %19, %20 : vector<8x128xi32>
    %22 = vector.extract_strided_slice %3 {offsets = [0, 8], sizes = [16, 8], strides = [1, 1]} : vector<16x64xbf16> to vector<16x8xbf16>
    %23 = arith.sitofp %21 : vector<8x128xi32> to vector<8x128xbf16>
    %cst_12 = arith.constant dense<0.000000e+00> : vector<16x128xf32>
    %24 = tpu.matmul %22, %23, %cst_12 {dimension_numbers = #tpu.dot_dimension_numbers<[1], [0], [0], [1], [0, 0, 1, 1], [], []>} : vector<16x8xbf16>, vector<8x128xbf16>, vector<16x128xf32> -> vector<16x128xf32>
    %25 = arith.addf %17, %24 : vector<16x128xf32>
    %c8_i32 = arith.constant 8 : i32
    %26 = vector.broadcast %c8_i32 : i32 to vector<8x128xi32>
    %27 = arith.shrsi %10, %26 : vector<8x128xi32>
    %c15_i32_13 = arith.constant 15 : i32
    %28 = vector.broadcast %c15_i32_13 : i32 to vector<8x128xi32>
    %29 = arith.andi %27, %28 : vector<8x128xi32>
    %30 = vector.extract_strided_slice %3 {offsets = [0, 16], sizes = [16, 8], strides = [1, 1]} : vector<16x64xbf16> to vector<16x8xbf16>
    %31 = arith.sitofp %29 : vector<8x128xi32> to vector<8x128xbf16>
    %cst_14 = arith.constant dense<0.000000e+00> : vector<16x128xf32>
    %32 = tpu.matmul %30, %31, %cst_14 {dimension_numbers = #tpu.dot_dimension_numbers<[1], [0], [0], [1], [0, 0, 1, 1], [], []>} : vector<16x8xbf16>, vector<8x128xbf16>, vector<16x128xf32> -> vector<16x128xf32>
    %33 = arith.addf %25, %32 : vector<16x128xf32>
    %c12_i32 = arith.constant 12 : i32
    %34 = vector.broadcast %c12_i32 : i32 to vector<8x128xi32>
    %35 = arith.shrsi %10, %34 : vector<8x128xi32>
    %c15_i32_15 = arith.constant 15 : i32
    %36 = vector.broadcast %c15_i32_15 : i32 to vector<8x128xi32>
    %37 = arith.andi %35, %36 : vector<8x128xi32>
    %38 = vector.extract_strided_slice %3 {offsets = [0, 24], sizes = [16, 8], strides = [1, 1]} : vector<16x64xbf16> to vector<16x8xbf16>
    %39 = arith.sitofp %37 : vector<8x128xi32> to vector<8x128xbf16>
    %cst_16 = arith.constant dense<0.000000e+00> : vector<16x128xf32>
    %40 = tpu.matmul %38, %39, %cst_16 {dimension_numbers = #tpu.dot_dimension_numbers<[1], [0], [0], [1], [0, 0, 1, 1], [], []>} : vector<16x8xbf16>, vector<8x128xbf16>, vector<16x128xf32> -> vector<16x128xf32>
    %41 = arith.addf %33, %40 : vector<16x128xf32>
    %c16_i32 = arith.constant 16 : i32
    %42 = vector.broadcast %c16_i32 : i32 to vector<8x128xi32>
    %43 = arith.shrsi %10, %42 : vector<8x128xi32>
    %c15_i32_17 = arith.constant 15 : i32
    %44 = vector.broadcast %c15_i32_17 : i32 to vector<8x128xi32>
    %45 = arith.andi %43, %44 : vector<8x128xi32>
    %46 = vector.extract_strided_slice %3 {offsets = [0, 32], sizes = [16, 8], strides = [1, 1]} : vector<16x64xbf16> to vector<16x8xbf16>
    %47 = arith.sitofp %45 : vector<8x128xi32> to vector<8x128xbf16>
    %cst_18 = arith.constant dense<0.000000e+00> : vector<16x128xf32>
    %48 = tpu.matmul %46, %47, %cst_18 {dimension_numbers = #tpu.dot_dimension_numbers<[1], [0], [0], [1], [0, 0, 1, 1], [], []>} : vector<16x8xbf16>, vector<8x128xbf16>, vector<16x128xf32> -> vector<16x128xf32>
    %49 = arith.addf %41, %48 : vector<16x128xf32>
    %c20_i32 = arith.constant 20 : i32
    %50 = vector.broadcast %c20_i32 : i32 to vector<8x128xi32>
    %51 = arith.shrsi %10, %50 : vector<8x128xi32>
    %c15_i32_19 = arith.constant 15 : i32
    %52 = vector.broadcast %c15_i32_19 : i32 to vector<8x128xi32>
    %53 = arith.andi %51, %52 : vector<8x128xi32>
    %54 = vector.extract_strided_slice %3 {offsets = [0, 40], sizes = [16, 8], strides = [1, 1]} : vector<16x64xbf16> to vector<16x8xbf16>
    %55 = arith.sitofp %53 : vector<8x128xi32> to vector<8x128xbf16>
    %cst_20 = arith.constant dense<0.000000e+00> : vector<16x128xf32>
    %56 = tpu.matmul %54, %55, %cst_20 {dimension_numbers = #tpu.dot_dimension_numbers<[1], [0], [0], [1], [0, 0, 1, 1], [], []>} : vector<16x8xbf16>, vector<8x128xbf16>, vector<16x128xf32> -> vector<16x128xf32>
    %57 = arith.addf %49, %56 : vector<16x128xf32>
    %c24_i32 = arith.constant 24 : i32
    %58 = vector.broadcast %c24_i32 : i32 to vector<8x128xi32>
    %59 = arith.shrsi %10, %58 : vector<8x128xi32>
    %c15_i32_21 = arith.constant 15 : i32
    %60 = vector.broadcast %c15_i32_21 : i32 to vector<8x128xi32>
    %61 = arith.andi %59, %60 : vector<8x128xi32>
    %62 = vector.extract_strided_slice %3 {offsets = [0, 48], sizes = [16, 8], strides = [1, 1]} : vector<16x64xbf16> to vector<16x8xbf16>
    %63 = arith.sitofp %61 : vector<8x128xi32> to vector<8x128xbf16>
    %cst_22 = arith.constant dense<0.000000e+00> : vector<16x128xf32>
    %64 = tpu.matmul %62, %63, %cst_22 {dimension_numbers = #tpu.dot_dimension_numbers<[1], [0], [0], [1], [0, 0, 1, 1], [], []>} : vector<16x8xbf16>, vector<8x128xbf16>, vector<16x128xf32> -> vector<16x128xf32>
    %65 = arith.addf %57, %64 : vector<16x128xf32>
    %c28_i32 = arith.constant 28 : i32
    %66 = vector.broadcast %c28_i32 : i32 to vector<8x128xi32>
    %67 = arith.shrsi %10, %66 : vector<8x128xi32>
    %c15_i32_23 = arith.constant 15 : i32
    %68 = vector.broadcast %c15_i32_23 : i32 to vector<8x128xi32>
    %69 = arith.andi %67, %68 : vector<8x128xi32>
    %70 = vector.extract_strided_slice %3 {offsets = [0, 56], sizes = [16, 8], strides = [1, 1]} : vector<16x64xbf16> to vector<16x8xbf16>
    %71 = arith.sitofp %69 : vector<8x128xi32> to vector<8x128xbf16>
    %cst_24 = arith.constant dense<0.000000e+00> : vector<16x128xf32>
    %72 = tpu.matmul %70, %71, %cst_24 {dimension_numbers = #tpu.dot_dimension_numbers<[1], [0], [0], [1], [0, 0, 1, 1], [], []>} : vector<16x8xbf16>, vector<8x128xbf16>, vector<16x128xf32> -> vector<16x128xf32>
    %73 = arith.addf %65, %72 : vector<16x128xf32>
    %c0_25 = arith.constant 0 : index
    %c0_26 = arith.constant 0 : index
    %74 = vector.load %arg9[%c0_25, %c0_26] : memref<16x128xf32, #tpu.memory_space<vmem>>, vector<16x128xf32>
    tpu.vector_store %arg9[%c0_25, %c0_26], %73 {strides = array<i32>} : memref<16x128xf32, #tpu.memory_space<vmem>>, vector<16x128xf32>,
    %c0_i32_27 = arith.constant 0 : i32
    %75 = arith.cmpi eq, %arg2, %c0_i32_27 : i32
    %76 = arith.extui %75 : i1 to i32
    %c0_i32_28 = arith.constant 0 : i32
    %77 = arith.cmpi ne, %76, %c0_i32_28 : i32
    scf.if %77 {
      %c0_29 = arith.constant 0 : index
      %c0_30 = arith.constant 0 : index
      %78 = vector.load %arg9[%c0_29, %c0_30] : memref<16x128xf32, #tpu.memory_space<vmem>>, vector<16x128xf32>
      %c0_31 = arith.constant 0 : index
      %c0_32 = arith.constant 0 : index
      %79 = vector.load %arg5[%c0_31, %c0_32] : memref<1x128xf32, #tpu.memory_space<vmem>>, vector<1x128xf32>
      %80 = vector.broadcast %79 : vector<1x128xf32> to vector<16x128xf32>
      %81 = arith.mulf %78, %80 : vector<16x128xf32>
      %c0_33 = arith.constant 0 : index
      %c0_34 = arith.constant 0 : index
      %82 = vector.load %arg10[%c0_33, %c0_34] : memref<16x1xf32, #tpu.memory_space<vmem>>, vector<16x1xf32>
      %c0_35 = arith.constant 0 : index
      %c0_36 = arith.constant 0 : index
      %83 = vector.load %arg6[%c0_35, %c0_36] : memref<1x128xf32, #tpu.memory_space<vmem>>, vector<1x128xf32>
      %84 = vector.broadcast %82 : vector<16x1xf32> to vector<16x128xf32>
      %85 = vector.broadcast %83 : vector<1x128xf32> to vector<16x128xf32>
      %86 = arith.mulf %84, %85 : vector<16x128xf32>
      %87 = arith.subf %81, %86 : vector<16x128xf32>
      %c0_37 = arith.constant 0 : index
      %c0_38 = arith.constant 0 : index
      %88 = vector.load %arg7[%c0_37, %c0_38] : memref<1x128xf32, #tpu.memory_space<vmem>>, vector<1x128xf32>
      %89 = vector.broadcast %88 : vector<1x128xf32> to vector<16x128xf32>
      %90 = arith.addf %87, %89 : vector<16x128xf32>
      %91 = arith.truncf %90 : vector<16x128xf32> to vector<16x128xbf16>
      %c0_39 = arith.constant 0 : index
      %c0_40 = arith.constant 0 : index
      %92 = vector.load %arg8[%c0_39, %c0_40] : memref<16x128xbf16, #tpu.memory_space<vmem>>, vector<16x128xbf16>
      tpu.vector_store %arg8[%c0_39, %c0_40], %91 {strides = array<i32>} : memref<16x128xbf16, #tpu.memory_space<vmem>>, vector<16x128xbf16>,
    } else {
    }
    return
  }
  func.func @transform_0(%arg0: i32, %arg1: i32, %arg2: i32) -> (i32, i32) {
    %c0_i32 = arith.constant 0 : i32
    return %arg0, %arg2 : i32, i32
  }
  func.func @transform_1(%arg0: i32, %arg1: i32, %arg2: i32) -> (i32, i32) {
    %c0_i32 = arith.constant 0 : i32
    return %arg2, %arg1 : i32, i32
  }
  func.func @transform_2(%arg0: i32, %arg1: i32, %arg2: i32) -> (i32, i32) {
    %c0_i32 = arith.constant 0 : i32
    %c0_i32_0 = arith.constant 0 : i32
    return %c0_i32, %arg1 : i32, i32
  }
  func.func @transform_3(%arg0: i32, %arg1: i32, %arg2: i32) -> (i32, i32) {
    %c0_i32 = arith.constant 0 : i32
    %c0_i32_0 = arith.constant 0 : i32
    return %c0_i32, %arg1 : i32, i32
  }
  func.func @transform_4(%arg0: i32, %arg1: i32, %arg2: i32) -> (i32, i32) {
    %c0_i32 = arith.constant 0 : i32
    %c0_i32_0 = arith.constant 0 : i32
    return %c0_i32, %arg1 : i32, i32
  }
  func.func @transform_5(%arg0: i32, %arg1: i32, %arg2: i32) -> (i32, i32) {
    %c0_i32 = arith.constant 0 : i32
    return %arg0, %arg1 : i32, i32
  }
}

</mosaic_0001>

<bundles_post_ra>
// kernel: _quant_matmul4.1
= control target key start
LH: loop header
LB: loop body
LE: loop exit
PB: predicated region body
PF: predicated region fallthrough
CT: control target
= control target key end

     0   :  { %s1288_s18 = smov 0   ;;  %s1290_s19 = smov 0   ;;  %s1434_s0 = inlined_call_operand.vmem [shape: bf16[16,64], index: 0, kind: input, shape index: {}]   ;;  %s1435_s1 = inlined_call_operand.vmem [shape: s32[8,256], index: 1, kind: input, shape index: {}]   ;;  %s1436_s2 = inlined_call_operand.vmem [shape: f32[1,256], index: 2, kind: input, shape index: {}]   ;;  %s1437_s3 = inlined_call_operand.vmem [shape: f32[1,256], index: 3, kind: input, shape index: {}]   ;;  %s1438_s4 = inlined_call_operand.vmem [shape: f32[1,256], index: 4, kind: input, shape index: {}]   ;;  %s1439_s5 = inlined_call_operand.vmem [shape: bf16[16,256], index: 5, kind: output, shape index: {}]  }
   0x1   :  { %s1292_s20 = smov 0   ;;  %s1294_s21 = smov 0  }
   0x2   :  { %s1296_s22 = smov 0  }
   0x3 LB: > { %s1030_s23 = sadd.s32 4294967295, %s1246_s22   ;;  %s30_s24 = sadd.s32 1, %s1242_s21  ;;  %s1246_s22 = sphi %s1296_s22, %s15_s22   ;;  %s1242_s21 = sphi %s1294_s21, %s1444_s21   ;;  %s1238_s20 = sphi %s1292_s20, %s1443_s20   ;;  %s1234_s19 = sphi %s1290_s19, %s1442_s19   ;;  %s1230_s18 = sphi %s1288_s18, %s1441_s18  }
   0x4   : > { %p32_p0 = scmp.ge.s32.totalorder %s30_s24, 2  ;;  %s177_s25 = sadd.s32 1, %s1234_s19 }
   0x5   : > { %p187_p1 = scmp.ne.s32.totalorder %s1234_s19, %s1230_s18  ;;  %p188_p2 = scmp.eq.s32.totalorder %s1030_s23, 1 }
   0x6   : > { %s1446_s24 = smov (%p32_p0, %s30_s24), 0  ;;  %p1035_p4 = scmp.ge.s32.totalorder %s1246_s22, 1 }
   0x7   : > { %p1320_p3 = por %p188_p2, %p187_p1  ;;  %s173_s27 = ssub.s32 %s1242_s21, %s1446_s24 }
   0x8   : > { %p253_p5 = scmp.lt.s32.totalorder %s1246_s22, 3  ;;  %p175_p6 = scmp.eq.s32.totalorder %s173_s27, 0 }
   0xa   : > { %p254_p7 = pnand %p1035_p4, %p253_p5 }
   0xb   : > { %s1329_s28 = scalar_select %p175_p6, %s1234_s19, %s177_s25  }
   0xc   : > { %257 = sbr.rel (%p254_p7) target bundleno = 399 (0x18f), region = 40  ;;  %v1334_v0 = vld [vmem:[%s1434_s0] sm:$0xff] (!%p254_p7)   ;;  %v1248_v1 = vmov (!%p254_p7), 0.0   ;;  %vm1249_vm0 = vmmov (!%p254_p7), 0   ;;  %s1250_s6 = smov (!%p254_p7), 96   ;;  %vm370_vm1 = vcmask (!%p254_p7), 1043456  }
   0xd   : > { %1080 = vmatprep.subr.bf16.mxu1 (!%p254_p7), %v1248_v1  ;;  %1104 = vmatprep.subr.bf16.mxu0 (!%p254_p7), %v1248_v1  ;;  %s1251_s7 = smov (!%p254_p7), 88   ;;  %p311_p8 = scmp.lt.s32.totalorder (!%p254_p7), %s1238_s20, 1  ;;  %vm366_vm2 = vcmask (!%p254_p7), 64512   ;;  %v342_v41 = vunpack.c.h.bf16 (!%p254_p7), %v1334_v0  ;;  %v341_v42 = vunpack.c.l.bf16 (!%p254_p7), %v1334_v0  ;;  %vm343_vm3 = vcmask (!%p254_p7), 523264  }
   0xe   : > { %1082 = vmatprep.mubr.msk.bf16.mxu1 (!%p254_p7), %vm1249_vm0, %v1248_v1  ;;  %1106 = vmatprep.mubr.msk.bf16.mxu0 (!%p254_p7), %vm1249_vm0, %v1248_v1  ;;  %s1252_s9 = smov (!%p254_p7), 120   ;;  %s1253_s10 = smov (!%p254_p7), 112   ;;  %vm334_vm4 = vcmask (!%p254_p7), 7168   ;;  %v1257_v45 = vmov (!%p254_p7), 0  }
   0xf   : > { %586 = vrot.lane.b32.xlu0 (!%p254_p7), %v1334_v0, %s1250_s6  ;;  %641 = vrot.lane.b32.xlu1 (!%p254_p7), %v1334_v0, %s1251_s7  ;;  %s1254_s15 = smov (!%p254_p7), 80   ;;  %s1255_s16 = smov (!%p254_p7), 104   ;;  %v347_v43 = vsel (!%p254_p7), %vm343_vm3, %v342_v41, 0.0  ;;  %v344_v44 = vsel (!%p254_p7), %vm343_vm3, %v341_v42, 0.0  ;;  %335 = vst.msk [vmem:[#allocation3] sm:$0xff] (!%p254_p7), %vm334_vm4, %v1248_v1  ;;  %336 = vst.msk [vmem:[#allocation3 + $0x8] sm:$0xff] (!%p254_p7), %vm334_vm4, %v1248_v1 }
  0x10   : > { %s1256_s17 = smov (!%p254_p7), 72   ;;  %1204 = vset.pattern.permute.xlu0 (!%p254_p7), %v1257_v45  ;;  %1205 = vset.pattern.permute.xlu1 (!%p254_p7), %v1257_v45 }
  0x13   : > { %s1346_s8 = scalar_select %p311_p8, %s1238_s20, 1  ;;  %421 = vrot.lane.b32.xlu0 %v1334_v0, %s1252_s9  ;;  %476 = vrot.lane.b32.xlu1 %v1334_v0, %s1253_s10 }
  0x15   : > { %s1037_s11 = sshll.u32 %s1346_s8, 3  ;;  %s322_s27 = scalar_lea.vmem %s1437_s3, %s1346_s8 }
  0x16   : > { %s316_s14 = scalar_lea.vmem %s1435_s1, %s1037_s11  ;;  %v340_v53 = vld [vmem:[#allocation3 + $0x8] sm:$0xff]  ;;  %v339_v54 = vld [vmem:[#allocation3] sm:$0xff]  ;;  %s319_s6 = scalar_lea.vmem %s1436_s2, %s1346_s8 }
  0x17   : > { %v355_v2 = vld [vmem:[%s316_s14] sm:$0xff]  ;;  %696 = vrot.lane.b32.xlu0 %v1334_v0, %s1254_s15  ;;  %531 = vrot.lane.b32.xlu1 %v1334_v0, %s1255_s16  ;;  %s325_s10 = scalar_lea.vmem %s1438_s4, %s1346_s8  ;;  %s297_s11 = sand.u32 1, %s1230_s18  }
  0x18   : > { %v358_v3 = vand.u32 15, %v355_v2  ;;  %v582_v4 = vshra.s32 %v355_v2, 16  ;;  %v417_v5 = vshra.s32 %v355_v2, 4  ;;  %v637_v6 = vshra.s32 %v355_v2, 20  ;;  %s1036_s12 = sshll.u32 %s297_s11, 3  ;;  %s1054_s14 = sshll.u32 (%p1320_p3), %s1238_s20, 2 }
  0x19   : > { %v472_v7 = vshra.s32 %v355_v2, 8  ;;  %v692_v8 = vshra.s32 %v355_v2, 24  ;;  %v527_v9 = vshra.s32 %v355_v2, 12  ;;  %v1046_v24 = vshrl.u32 %v355_v2, 28  ;;  %v1049_v2 = vld [vmem:[%s322_s27] ss:$0 sm:$0xff]  ;;  %s871_s18 = scalar_lea.vmem (%p1320_p3), %s1439_s5, %s1054_s14 }
  0x1a   : > { %v359_v10 = vcvt.s32.f32 %v358_v3  ;;  %v583_v11 = vand.u32 15, %v582_v4  ;;  %v418_v12 = vand.u32 15, %v417_v5  ;;  %v638_v13 = vand.u32 15, %v637_v6  ;;  %v1048_v4 = vld [vmem:[%s319_s6] ss:$0 sm:$0xff]  ;;  %s299_s13 = scalar_lea.vmem [#allocation4], %s1036_s12 }
  0x1b   : > { %v473_v14 = vand.u32 15, %v472_v7  ;;  %v693_v15 = vand.u32 15, %v692_v8  ;;  %v528_v16 = vand.u32 15, %v527_v9  ;;  %751 = vrot.lane.b32.xlu0 %v1334_v0, %s1256_s17  ;;  %v749_v32 = vcvt.s32.f32 %v1046_v24 }
  0x1c   : > { %v360_v17 = vpack.c.bf16 %v359_v10, %v359_v10  ;;  %v584_v18 = vcvt.s32.f32 %v583_v11  ;;  %v419_v19 = vcvt.s32.f32 %v418_v12  ;;  %v639_v20 = vcvt.s32.f32 %v638_v13 }
  0x1d   : > { %v474_v21 = vcvt.s32.f32 %v473_v14  ;;  %v694_v22 = vcvt.s32.f32 %v693_v15  ;;  %v529_v23 = vcvt.s32.f32 %v528_v16  ;;  %v750_v39 = vpack.c.bf16 %v749_v32, %v749_v32  ;;  %v1050_v16 = vld [vmem:[%s325_s10] ss:$0 sm:$0xff] }
  0x1e   : > { %v372_v25 = vsel %vm370_vm1, %v360_v17, 0  ;;  %v585_v26 = vpack.c.bf16 %v584_v18, %v584_v18  ;;  %v420_v27 = vpack.c.bf16 %v419_v19, %v419_v19  ;;  %v640_v28 = vpack.c.bf16 %v639_v20, %v639_v20 }
  0x1f   : > { %1081 = vmatpush3.bf16.msra.mxu1 %v372_v25  ;;  %v475_v29 = vpack.c.bf16 %v474_v21, %v474_v21  ;;  %v695_v30 = vpack.c.bf16 %v694_v22, %v694_v22  ;;  %v530_v31 = vpack.c.bf16 %v529_v23, %v529_v23  ;;  %v757_v40 = vsel %vm370_vm1, %v750_v39, 0 }
  0x20   : > { %v592_v33 = vsel %vm370_vm1, %v585_v26, 0  ;;  %1086 = vmatprep.subr.bf16.mxu1 %v1248_v1  ;;  %v427_v34 = vsel %vm370_vm1, %v420_v27, 0  ;;  %v647_v35 = vsel %vm370_vm1, %v640_v28, 0 }
  0x21   : > { %1105 = vmatpush3.bf16.msra.mxu0 %v592_v33  ;;  %v482_v36 = vsel %vm370_vm1, %v475_v29, 0  ;;  %v702_v37 = vsel %vm370_vm1, %v695_v30, 0  ;;  %v537_v38 = vsel %vm370_vm1, %v530_v31, 0 }
  0x22   : > { %1083 = vmatmul.mubr.msk.bf16.vlgmr.msra.gmra.mrb[0].mxu1 %vm366_vm2, %v1334_v0  ;;  %1110 = vmatprep.subr.bf16.mxu0 %v1248_v1 }
  0x23   : > { %1087 = vmatpush3.bf16.msra.mxu1 %v427_v34  ;;  %1088 = vmatprep.mubr.msk.bf16.mxu1 %vm1249_vm0, %v1248_v1 }
  0x24   : > { %1092 = vmatprep.subr.bf16.mxu1 %v1248_v1 }
  0x3a   : > { %348 = vadd.xlane.f32.xlu0 %v347_v43 }
  0x3b   : > { %345 = vadd.xlane.f32.xlu1 %v344_v44 }
  0x81   : > { %v587_v46 = vpop.permute.xlu0 %586  ;;  %v642_v48 = vpop.permute.xlu1 %641 }
  0x82   : > { %1107 = vmatmul.mubr.msk.bf16.vlgmr.msra.gmra.mrb[0].mxu0 %vm366_vm2, %v587_v46 }
  0x83   : > { %1111 = vmatpush3.bf16.msra.mxu0 %v647_v35  ;;  %1112 = vmatprep.mubr.msk.bf16.mxu0 %vm1249_vm0, %v1248_v1 }
  0x84   : > { %1116 = vmatprep.subr.bf16.mxu0 %v1248_v1 }
  0x85   : > { %v422_v47 = vpop.permute.xlu0 %421  ;;  %v477_v49 = vpop.permute.xlu1 %476 }
  0x86   : > { %1089 = vmatmul.mubr.msk.bf16.vlgmr.msra.gmra.mrb[0].mxu1 %vm366_vm2, %v422_v47 }
  0x87   : > { %1093 = vmatpush3.bf16.msra.mxu1 %v482_v36  ;;  %1094 = vmatprep.mubr.msk.bf16.mxu1 %vm1249_vm0, %v1248_v1 }
  0x88   : > { %1098 = vmatprep.subr.bf16.mxu1 %v1248_v1 }
  0x89   : > { %v697_v50 = vpop.permute.xlu0 %696  ;;  %v532_v51 = vpop.permute.xlu1 %531 }
  0x8d   : > { %v752_v52 = vpop.permute.xlu0 %751 }
  0x8e   : > { %1113 = vmatmul.mubr.msk.bf16.vlgmr.msra.gmra.mrb[0].mxu0 %vm366_vm2, %v642_v48 }
  0x8f   : > { %1117 = vmatpush3.bf16.msra.mxu0 %v702_v37  ;;  %1118 = vmatprep.mubr.msk.bf16.mxu0 %vm1249_vm0, %v1248_v1 }
  0x90   : > { %1122 = vmatprep.subr.bf16.mxu0 %v1248_v1 }
  0x92   : > { %1095 = vmatmul.mubr.msk.bf16.vlgmr.msra.gmra.mrb[0].mxu1 %vm366_vm2, %v477_v49 }
  0x93   : > { %1099 = vmatpush3.bf16.msra.mxu1 %v537_v38  ;;  %1100 = vmatprep.mubr.msk.bf16.mxu1 %vm1249_vm0, %v1248_v1 }
  0x9a   : > { %1119 = vmatmul.mubr.msk.bf16.vlgmr.msra.gmra.mrb[0].mxu0 %vm366_vm2, %v697_v50 }
  0x9b   : > { %1123 = vmatpush3.bf16.msra.mxu0 %v757_v40  ;;  %1124 = vmatprep.mubr.msk.bf16.mxu0 %vm1249_vm0, %v1248_v1 }
  0x9e   : > { %1101 = vmatmul.mubr.msk.bf16.vlgmr.msra.gmra.mrb[0].mxu1 %vm366_vm2, %v532_v51 }
  0xa6   : > { %1125 = vmatmul.mubr.msk.bf16.vlgmr.msra.gmra.mrb[0].mxu0 %vm366_vm2, %v752_v52 }
  0xc7   : > { %v349_v55 = vpop.xlane.xlu0 %348 }
  0xc8   : > { %v346_v56 = vpop.xlane.xlu1 %345  ;;  %v351_v57 = vadd.f32 %v349_v55, %v340_v53 }
  0xc9   : > { %v350_v58 = vadd.f32 %v346_v56, %v339_v54 }
  0xca   : > { %354 = vst.msk [vmem:[#allocation3 + $0x8] sm:$0xff] %vm334_vm4, %v351_v57 }
  0xcb   : > { %353 = vst.msk [vmem:[#allocation3] sm:$0xff] %vm334_vm4, %v350_v58 }
  0xd1   : > { %v819_v59 = vld [vmem:[#allocation3 + $0x8] sm:$0xff] }
  0xd2   : > { %v818_v60 = vld [vmem:[#allocation3] sm:$0xff]  ;;  %828 = vperm.xlu1 %1205, %v819_v59  }
  0xd3   : > { %823 = vperm.xlu0 %1204, %v818_v60  }
 0x151   : > { %v829_v5 = vpop.permute.xlu1 %828 }
 0x152   : > { %v824_v1 = vpop.permute.xlu0 %823  ;;  %v838_v13 = vmul.f32 %v1049_v2, %v829_v5 }
 0x153   : > { %v837_v8 = vmul.f32 %v1049_v2, %v824_v1 }
 0x171   : > { %v573_v61 = vpop.f32.mrb[0].mxu1 }
 0x172   : > { %v1102_v62 = vpop.f32.mrb[1].mxu1 }
 0x173   : > { %v576_v63 = vpop.f32.mrb[2].mxu1 }
 0x174   : > { %v1103_v0 = vpop.f32.mrb[3].mxu1 }
 0x179   : > { %v793_v3 = vpop.f32.mrb[0].mxu0 }
 0x17a   : > { %v1128_v6 = vadd.f32 %v793_v3, %v573_v61  ;;  %v1126_v7 = vpop.f32.mrb[1].mxu0 }
 0x17b   : > { %v796_v9 = vpop.f32.mrb[2].mxu0 }
 0x17c   : > { %v816_v10 = vmul.f32 %v1128_v6, %v1048_v4  ;;  %v1129_v11 = vadd.f32 %v796_v9, %v576_v63  ;;  %v1127_v12 = vpop.f32.mrb[3].mxu0 }
 0x17e   : > { %v839_v14 = vsub.f32 %v816_v10, %v837_v8  ;;  %v817_v15 = vmul.f32 %v1129_v11, %v1048_v4 }
 0x180   : > { %v840_v17 = vsub.f32 %v817_v15, %v838_v13  ;;  %v848_v18 = vadd.f32 %v1050_v16, %v839_v14  ;;  %866 = sbr.rel (!%p1320_p3) target bundleno = 399 (0x18f), region = 52 }
 0x182   : > { %v849_v19 = vadd.f32 %v1050_v16, %v840_v17 }
 0x184   : > { %v1062_v20 = vpack.c.bf16 %v849_v19, %v848_v18 }
 0x186   : > { %1063 = vst [vmem:[%s299_s13] sm:$0xff] %v1062_v20  }
 0x18d   : > { %v887_v21 = vld [vmem:[%s299_s13] sm:$0xf]  ;;  %v889_v22 = vld [vmem:[%s299_s13 + $0x4] sm:$0xf] }
 0x18e   : > { %888 = vst [vmem:[%s871_s18] sm:$0xf] %v887_v21  ;;  %890 = vst [vmem:[%s871_s18 + $0x8] sm:$0xf] %v889_v22 }
 0x18f PF: > { %s15_s22 = sadd.s32 1, %s1246_s22   ;;  %s1441_s18 = smov %s1234_s19 }
 0x190   : > { %p12_p9 = scmp.ge.s32.totalorder %s15_s22, 4   ;;  %s1442_s19 = smov %s1329_s28 }
 0x191   : > { %s1443_s20 = smov %s1242_s21  ;;  %s1444_s21 = smov %s1446_s24 }
 0x192   :  { %14 = sbr.rel (!%p12_p9) target bundleno = 3 (0x3), region = 131 }

</bundles_post_ra>
